<compile_context>
chip_gen: v7x
topology: tpu7x:2x2x1
jax: 0.10.0
libtpu: 0.0.40
codegen_flags: <defaults>
</compile_context>

<pallas_src>
import functools

import jax
import jax.numpy as jnp
from jax import lax
from jax.experimental import pallas as pl
from jax.experimental.pallas import tpu as pltpu

# TODO(synk): const.KLD_ALPHA is not available in-script; wire the real config
# value through if/when the config module is available.
KLD_ALPHA = 1e-4

_LANES = 128
_SUBLANES = 8
_MAX_TILE_ROWS = 4096     # (4096, 128) f32 = 2 MiB per pipeline buffer
_NUM_SPLITS = 2           # leading "parallel" axis (2 TCs on v7x; loop elsewhere)


def _vae_loss_kernel(recon_ref, x_ref, mean_ref, std_ref,
                     sq_out_ref, kld_out_ref, *,
                     tile_rows, tiles_per_split, rows_valid, needs_mask):
    c = pl.program_id(0)          # parallel split index
    i = pl.program_id(1)          # reduction step within the split

    # Init the resident per-split accumulator block once per split.
    @pl.when(i == 0)
    def _init():
        sq_out_ref[...] = jnp.zeros_like(sq_out_ref)

    # ---- streaming squared-error partial sums (hot loop) ----
    r = recon_ref[...].astype(jnp.float32)     # upcast in-kernel (native dtype DMA)
    x = x_ref[...].astype(jnp.float32)
    d = r - x
    if needs_mask:
        # Zero rows past the real array: Pallas edge-block padding (unspecified
        # contents) and clamped duplicate blocks of an uneven split.
        row0 = (c * tiles_per_split + i) * tile_rows
        row_ids = row0 + lax.broadcasted_iota(jnp.int32, d.shape, 0)
        d = jnp.where(row_ids < rows_valid, d, 0.0)
    sq = d * d
    # Fold the tile down to a single (8,128) vreg with pure elementwise adds
    # (no cross-lane traffic).
    sq_out_ref[...] += jnp.sum(sq.reshape(-1, _SUBLANES, _LANES), axis=0)

    # ---- KLD term: once per split, outside the hot loop ----
    @pl.when(i == pl.num_programs(1) - 1)
    def _finalize():
        m = mean_ref[...]
        s = std_ref[...]
        var = s * s
        # padded entries (mean=0, std=1) contribute exactly 0
        terms = 1.0 + jnp.log(var) - m * m - var
        kld_block = jnp.sum(terms.reshape(-1, _SUBLANES, _LANES), axis=0)
        kld_out_ref[...] = jnp.where(c == 0, kld_block,
                                     jnp.zeros_like(kld_block))


def _as_lane_rows(a, pad_value):
    """Flatten to a lane-dense (rows, 128) view with rows a multiple of 8.

    No copy in the common case (size % 1024 == 0); otherwise a small pad."""
    flat = a.reshape(-1)
    n = flat.shape[0]
    rows = pl.cdiv(n, _LANES * _SUBLANES) * _SUBLANES
    n_padded = rows * _LANES
    if n_padded != n:
        flat = jnp.pad(flat, (0, n_padded - n), constant_values=pad_value)
    return flat.reshape(rows, _LANES)


def _round_up(x, m):
    return ((x + m - 1) // m) * m


def vae_loss(recon, X, mean, std_dev, alpha=KLD_ALPHA):
    """Pallas equivalent of VAELoss.forward((recon, mean, std_dev), X)."""
    n_elems = recon.size                      # nn.MSELoss default reduction='mean'

    # Big streams: native dtype; zero-padded only if needed (pad diff == 0).
    rf = _as_lane_rows(recon, 0)
    xf = _as_lane_rows(X, 0)
    # Tiny latent stats: f32, padded so each padded entry contributes 0 to KLD.
    mf = _as_lane_rows(mean.astype(jnp.float32), 0.0)
    sf = _as_lane_rows(std_dev.astype(jnp.float32), 1.0)

    rows = rf.shape[0]                        # multiple of 8 by construction
    # Cap the tile so two splits both get work whenever possible, but never
    # exceed _MAX_TILE_ROWS (keeps pipeline buffers <= 2 MiB each).
    rows_per_split = _round_up(pl.cdiv(rows, _NUM_SPLITS), _SUBLANES)
    tile_rows = min(_MAX_TILE_ROWS, rows_per_split)
    tiles_total = pl.cdiv(rows, tile_rows)
    num_splits = min(_NUM_SPLITS, tiles_total)
    tiles_per_split = pl.cdiv(tiles_total, num_splits)
    # Clamp only when an uneven split could index past the last real block;
    # mask only when the grid does not cover the array exactly.
    needs_clamp = num_splits * tiles_per_split > tiles_total
    needs_mask = (num_splits * tiles_per_split * tile_rows) != rows

    if needs_clamp:
        def big_map(c, i):
            return (jnp.minimum(c * tiles_per_split + i, tiles_total - 1), 0)
    else:
        def big_map(c, i):
            return (c * tiles_per_split + i, 0)

    small_map = lambda c, i: (0, 0)           # resident tiny blocks

    kernel = functools.partial(
        _vae_loss_kernel,
        tile_rows=tile_rows,
        tiles_per_split=tiles_per_split,
        rows_valid=rows,
        needs_mask=needs_mask)

    out_block = pl.BlockSpec((_SUBLANES, _LANES), lambda c, i: (c, 0))
    stream_bytes = n_elems * (recon.dtype.itemsize + X.dtype.itemsize)
    cost = pl.CostEstimate(
        flops=3 * n_elems + 6 * mf.size,
        transcendentals=mf.size,
        bytes_accessed=stream_bytes + 2 * mf.size * 4
        + 2 * num_splits * _SUBLANES * _LANES * 4)

    sq_parts, kld_parts = pl.pallas_call(
        kernel,
        out_shape=(
            jax.ShapeDtypeStruct((num_splits * _SUBLANES, _LANES), jnp.float32),
            jax.ShapeDtypeStruct((num_splits * _SUBLANES, _LANES), jnp.float32),
        ),
        grid_spec=pltpu.PrefetchScalarGridSpec(
            num_scalar_prefetch=0,
            grid=(num_splits, tiles_per_split),
            in_specs=[
                pl.BlockSpec((tile_rows, _LANES), big_map),   # recon stream
                pl.BlockSpec((tile_rows, _LANES), big_map),   # X stream
                pl.BlockSpec(mf.shape, small_map),            # mean (resident)
                pl.BlockSpec(sf.shape, small_map),            # std  (resident)
            ],
            out_specs=(out_block, out_block),
        ),
        compiler_params=pltpu.CompilerParams(
            dimension_semantics=("parallel", "arbitrary"),
            vmem_limit_bytes=32 * 1024 * 1024),
        cost_estimate=cost,
    )(rf, xf, mf, sf)

    mse = jnp.sum(sq_parts) / n_elems
    kld = jnp.sum(kld_parts)
    return mse - alpha * kld


def vae_loss_ref(recon, X, mean, std_dev, alpha=KLD_ALPHA):
    recon = recon.astype(jnp.float32)
    X = X.astype(jnp.float32)
    mean = mean.astype(jnp.float32)
    std_dev = std_dev.astype(jnp.float32)
    var = std_dev ** 2
    mse = jnp.mean((recon - X) ** 2)
    kld = jnp.sum(1.0 + jnp.log(var) - mean ** 2 - var)
    return mse - alpha * kld


if __name__ == "__main__":
    key = jax.random.PRNGKey(0)

    # (image shape NCHW, latent dim)
    test_cases = [
        ((2, 4, 16, 16), 32),     # small canonical case (single tile / split)
        ((2, 3, 33, 65), 32),     # ragged size: exercises pad + tail mask
        ((4, 4, 128, 128), 32),   # even 2-way split, one tile per core
        ((32, 4, 128, 128), 32),  # multi-tile reduction per core, no mask
    ]

    for idx, (img_shape, latent) in enumerate(test_cases):
        k1, k2, k3, k4, _ = jax.random.split(jax.random.fold_in(key, idx), 5)
        recon = jax.random.normal(k1, img_shape, dtype=jnp.float32)
        X = jax.random.normal(k2, img_shape, dtype=jnp.float32)
        B = img_shape[0]
        mean = jax.random.normal(k3, (B, latent), dtype=jnp.float32)
        # std_dev must be strictly positive (log of its square is taken)
        std_dev = jnp.abs(jax.random.normal(k4, (B, latent),
                                            dtype=jnp.float32)) + 0.1

        loss = jax.block_until_ready(vae_loss(recon, X, mean, std_dev))
        expected = jax.block_until_ready(vae_loss_ref(recon, X, mean, std_dev))
        assert jnp.allclose(loss, expected, rtol=1e-5, atol=1e-5), (
            idx, loss, expected)

    print("KERNEL_OK")
</pallas_src>

<mosaic_0001>
module attributes {stable_mosaic.version = 11 : i64} {
  func.func @_vae_loss_kernel(%arg0: i32, %arg1: i32, %arg2: memref<8x128xf32, #tpu.memory_space<vmem>>, %arg3: memref<8x128xf32, #tpu.memory_space<vmem>>, %arg4: memref<8x128xf32, #tpu.memory_space<vmem>>, %arg5: memref<8x128xf32, #tpu.memory_space<vmem>>, %arg6: memref<8x128xf32, #tpu.memory_space<vmem>>, %arg7: memref<8x128xf32, #tpu.memory_space<vmem>>) attributes {dimension_semantics = [#tpu.dimension_semantics<parallel>, #tpu.dimension_semantics<arbitrary>], iteration_bounds = array<i64: 2, 1>, scalar_prefetch = 0 : i64, scratch_operands = 0 : i64, tpu.core_type = #tpu.core_type<tc>, window_params = [{transform_indices = @transform_0, window_bounds = array<i64: 8, 128>}, {transform_indices = @transform_1, window_bounds = array<i64: 8, 128>}, {pipeline_mode = #tpu.pipeline_mode<synchronous>, transform_indices = @transform_2, window_bounds = array<i64: 8, 128>}, {pipeline_mode = #tpu.pipeline_mode<synchronous>, transform_indices = @transform_3, window_bounds = array<i64: 8, 128>}, {transform_indices = @transform_4, window_bounds = array<i64: 8, 128>}, {transform_indices = @transform_5, window_bounds = array<i64: 8, 128>}]} {
    %c0_i32 = arith.constant 0 : i32
    %0 = arith.cmpi eq, %arg1, %c0_i32 : i32
    %1 = arith.extui %0 : i1 to i32
    %c0_i32_0 = arith.constant 0 : i32
    %2 = arith.cmpi ne, %1, %c0_i32_0 : i32
    scf.if %2 {
      %cst_10 = arith.constant 0.000000e+00 : f32
      %15 = vector.broadcast %cst_10 : f32 to vector<8x128xf32>
      %c0_11 = arith.constant 0 : index
      %c0_12 = arith.constant 0 : index
      %16 = vector.load %arg6[%c0_11, %c0_12] : memref<8x128xf32, #tpu.memory_space<vmem>>, vector<8x128xf32>
      tpu.vector_store %arg6[%c0_11, %c0_12], %15 {strides = array<i32>} : memref<8x128xf32, #tpu.memory_space<vmem>>, vector<8x128xf32>,
    } else {
    }
    %c0 = arith.constant 0 : index
    %c0_1 = arith.constant 0 : index
    %3 = vector.load %arg2[%c0, %c0_1] : memref<8x128xf32, #tpu.memory_space<vmem>>, vector<8x128xf32>
    %c0_2 = arith.constant 0 : index
    %c0_3 = arith.constant 0 : index
    %4 = vector.load %arg3[%c0_2, %c0_3] : memref<8x128xf32, #tpu.memory_space<vmem>>, vector<8x128xf32>
    %5 = arith.subf %3, %4 : vector<8x128xf32>
    %6 = arith.mulf %5, %5 : vector<8x128xf32>
    %c0_4 = arith.constant 0 : index
    %c0_5 = arith.constant 0 : index
    %7 = vector.load %arg6[%c0_4, %c0_5] : memref<8x128xf32, #tpu.memory_space<vmem>>, vector<8x128xf32>
    %8 = vector.shape_cast %6 : vector<8x128xf32> to vector<1x8x128xf32>
    %cst = arith.constant dense<0.000000e+00> : vector<8x128xf32>
    %9 = vector.multi_reduction <add>, %8, %cst [0] : vector<1x8x128xf32> to vector<8x128xf32>
    %10 = arith.addf %7, %9 : vector<8x128xf32>
    %c0_6 = arith.constant 0 : index
    %c0_7 = arith.constant 0 : index
    %11 = vector.load %arg6[%c0_6, %c0_7] : memref<8x128xf32, #tpu.memory_space<vmem>>, vector<8x128xf32>
    tpu.vector_store %arg6[%c0_6, %c0_7], %10 {strides = array<i32>} : memref<8x128xf32, #tpu.memory_space<vmem>>, vector<8x128xf32>,
    %c0_i32_8 = arith.constant 0 : i32
    %12 = arith.cmpi eq, %arg1, %c0_i32_8 : i32
    %13 = arith.extui %12 : i1 to i32
    %c0_i32_9 = arith.constant 0 : i32
    %14 = arith.cmpi ne, %13, %c0_i32_9 : i32
    scf.if %14 {
      %c0_10 = arith.constant 0 : index
      %c0_11 = arith.constant 0 : index
      %15 = vector.load %arg4[%c0_10, %c0_11] : memref<8x128xf32, #tpu.memory_space<vmem>>, vector<8x128xf32>
      %c0_12 = arith.constant 0 : index
      %c0_13 = arith.constant 0 : index
      %16 = vector.load %arg5[%c0_12, %c0_13] : memref<8x128xf32, #tpu.memory_space<vmem>>, vector<8x128xf32>
      %17 = arith.mulf %16, %16 : vector<8x128xf32>
      %18 = math.log %17 : vector<8x128xf32>
      %cst_14 = arith.constant 1.000000e+00 : f32
      %19 = vector.broadcast %cst_14 : f32 to vector<8x128xf32>
      %20 = arith.addf %19, %18 : vector<8x128xf32>
      %21 = arith.mulf %15, %15 : vector<8x128xf32>
      %22 = arith.subf %20, %21 : vector<8x128xf32>
      %23 = arith.subf %22, %17 : vector<8x128xf32>
      %24 = vector.shape_cast %23 : vector<8x128xf32> to vector<1x8x128xf32>
      %cst_15 = arith.constant dense<0.000000e+00> : vector<8x128xf32>
      %25 = vector.multi_reduction <add>, %24, %cst_15 [0] : vector<1x8x128xf32> to vector<8x128xf32>
      %c0_i32_16 = arith.constant 0 : i32
      %26 = arith.cmpi eq, %arg0, %c0_i32_16 : i32
      %cst_17 = arith.constant 0.000000e+00 : f32
      %27 = vector.broadcast %cst_17 : f32 to vector<8x128xf32>
      %28 = arith.select %26, %25, %27 : vector<8x128xf32>
      %c0_18 = arith.constant 0 : index
      %c0_19 = arith.constant 0 : index
      %29 = vector.load %arg7[%c0_18, %c0_19] : memref<8x128xf32, #tpu.memory_space<vmem>>, vector<8x128xf32>
      tpu.vector_store %arg7[%c0_18, %c0_19], %28 {strides = array<i32>} : memref<8x128xf32, #tpu.memory_space<vmem>>, vector<8x128xf32>,
    } else {
    }
    return
  }
  func.func @transform_0(%arg0: i32, %arg1: i32) -> (i32, i32) {
    %c1_i32 = arith.constant 1 : i32
    %0 = arith.muli %arg0, %c1_i32 : i32
    %1 = arith.addi %0, %arg1 : i32
    %c0_i32 = arith.constant 0 : i32
    %c0_i32_0 = arith.constant 0 : i32
    return %1, %c0_i32 : i32, i32
  }
  func.func @transform_1(%arg0: i32, %arg1: i32) -> (i32, i32) {
    %c1_i32 = arith.constant 1 : i32
    %0 = arith.muli %arg0, %c1_i32 : i32
    %1 = arith.addi %0, %arg1 : i32
    %c0_i32 = arith.constant 0 : i32
    %c0_i32_0 = arith.constant 0 : i32
    return %1, %c0_i32 : i32, i32
  }
  func.func @transform_2(%arg0: i32, %arg1: i32) -> (i32, i32) {
    %c0_i32 = arith.constant 0 : i32
    %c0_i32_0 = arith.constant 0 : i32
    %c0_i32_1 = arith.constant 0 : i32
    return %c0_i32, %c0_i32_0 : i32, i32
  }
  func.func @transform_3(%arg0: i32, %arg1: i32) -> (i32, i32) {
    %c0_i32 = arith.constant 0 : i32
    %c0_i32_0 = arith.constant 0 : i32
    %c0_i32_1 = arith.constant 0 : i32
    return %c0_i32, %c0_i32_0 : i32, i32
  }
  func.func @transform_4(%arg0: i32, %arg1: i32) -> (i32, i32) {
    %c0_i32 = arith.constant 0 : i32
    %c0_i32_0 = arith.constant 0 : i32
    return %arg0, %c0_i32 : i32, i32
  }
  func.func @transform_5(%arg0: i32, %arg1: i32) -> (i32, i32) {
    %c0_i32 = arith.constant 0 : i32
    %c0_i32_0 = arith.constant 0 : i32
    return %arg0, %c0_i32 : i32, i32
  }
}

</mosaic_0001>

<bundles_post_ra>
// kernel: tpu_custom_call.1
= control target key start
LH: loop header
LB: loop body
LE: loop exit
PB: predicated region body
PF: predicated region fallthrough
CT: control target
= control target key end

     0   :  { %s1173_s0 = inlined_call_operand.hbm [shape: f32[16,128], index: 0, kind: input, shape index: {}]   ;;  %s1174_s1 = inlined_call_operand.hbm [shape: f32[16,128], index: 1, kind: input, shape index: {}]   ;;  %s1175_s2 = inlined_call_operand.hbm [shape: f32[8,128], index: 2, kind: input, shape index: {}]   ;;  %s1176_s3 = inlined_call_operand.vmem [shape: f32[8,128], index: 3, kind: input, shape index: {}]   ;;  %s1177_s4 = inlined_call_operand.hbm [shape: f32[16,128], index: 4, kind: output, shape index: {0}]   ;;  %s1178_s5 = inlined_call_operand.hbm [shape: f32[16,128], index: 5, kind: output, shape index: {1}]  }
   0x1   :  { %1185 = sst [smem:[#allocation19_spill]] %s1175_s2 }
   0x2   :  { %11 = vsyncpa [#allocation3], 0 }
   0x3   :  { %13 = vsyncpa [#allocation3 + $0x1], 0 }
   0x4   :  { %14 = vsyncpa [#allocation6], 0 }
   0x5   :  { %16 = vsyncpa [#allocation6 + $0x1], 0 }
   0x6   :  { %17 = vsyncpa [#allocation4], 0 }
   0x7   :  { %19 = vsyncpa [#allocation4 + $0x1], 0 }
   0x8   :  { %20 = vsyncpa [#allocation10], 0 }
   0x9   :  { %22 = vsyncpa [#allocation10 + $0x1], 0  ;;  %s882_s18 = smov 0   ;;  %s884_s19 = smov 0  }
   0xa   :  { %s886_s20 = smov 0   ;;  %s888_s21 = smov 0  }
   0xb   :  { %s890_s22 = smov 0   ;;  %s892_s23 = smov 0  }
   0xc LB: > { %1186 = sst [smem:[#allocation16_spill]] %s841_s22  ;;  %s913_s24 = sadd.s32 4294967295, %s845_s23   ;;  %s845_s23 = sphi %s892_s23, %s28_s23   ;;  %s841_s22 = sphi %s890_s22, %s1208_s22   ;;  %s837_s21 = sphi %s888_s21, %s1207_s21   ;;  %s833_s20 = sphi %s886_s20, %s1211_s20   ;;  %s829_s19 = sphi %s884_s19, %s1210_s19   ;;  %s825_s18 = sphi %s882_s18, %s1209_s18  }
   0xd   : > { %s529_s25 = sadd.s32 4294967294, %s845_s23   ;;  %p62_p0 = scmp.ne.s32.totalorder %s829_s19, %s825_s18 }
   0xe   : > { %p1179_p1 = scmp.eq.s32.totalorder %s913_s24, 0  ;;  %p162_p3 = scmp.eq.s32.totalorder %s529_s25, 1 }
   0xf   : > { %p530_p5 = scmp.ge.s32.totalorder %s845_s23, 1  ;;  %p195_p7 = scmp.lt.s32.totalorder %s845_s23, 3 }
  0x10   : > { %p922_p4 = por %p1179_p1, %p62_p0  ;;  %p927_p6 = por %p162_p3, %p62_p0 }
  0x11   : > { %p932_p8 = pnand %p530_p5, %p195_p7  ;;  %s847_s29 = smov [#allocation7]  }
  0x12   : > { %s1187_s26 = scalar_select %p922_p4, 1, 0 }
  0x13   : > { %s1188_s27 = scalar_select %p927_p6, 1, 0 }
  0x14   : > { %s1189_s28 = scalar_select %p932_p8, 1, 0 }
  0x15   : > { %s208_s30 = sshll.u32 %s847_s29, 4  ;;  %p561_p10 = pneg %p932_p8  ;;  %s209_s30 = int_to_ptr.vmem [resolvable:$true] %s208_s30 }
  0x16   : > { %s40_s7 = sadd.s32 1, %s841_s22  ;;  %s49_s8 = sadd.s32 1, %s833_s20 }
  0x17   : > { %p941_p11 = pnand %p561_p10, %p1179_p1  ;;  %p947_p12 = scmp.ge.s32.totalorder %s40_s7, 2 }
  0x18   : > { %s1192_s2 = sld [smem:[#allocation19_spill]] }
  0x19   : > { %s1191_s9 = scalar_select %p947_p12, 1, 0 }
  0x1a   : > { %p637_p0 = pneg %p941_p11 }
  0x1e   : > { %s635_s12 = scalar_lea.hbm %s1192_s2, 128 }
  0x1f   : > { %p636_p13 = scmp.ne.s32.totalorder %s1192_s2, %s635_s12  ;;  %p642_p7 = scmp.lt.u32.totalorder %s635_s12, %s1192_s2 }
  0x21   : > { %p638_p3 = pnand %p637_p0, %p636_p13 }
  0x23   : > { %p639_p5 = pneg %p638_p3 }
  0x25   : > { %p644_p10 = pnand %p642_p7, %p639_p5 }
  0x27   : > { %647 = shalt.err (!%p644_p10)
}
  0x28   : > { %s648_s17 = scalar_lea.vmem %s209_s30, 128  ;;  %p656_p6 = scmp.lt.s32.totalorder %s209_s30, %s209_s30 }
  0x29   : > { %p649_p9 = scmp.ne.s32.totalorder %s209_s30, %s648_s17  ;;  %p657_p4 = scmp.lt.s32.totalorder %s648_s17, %s648_s17 }
  0x2b   : > { %p651_p1 = pnand %p649_p9, %p637_p0  ;;  %p658_p8 = por %p657_p4, %p656_p6 }
  0x2d   : > { %p652_p2 = pneg %p651_p1 }
  0x2f   : > { %p659_p12 = pnand %p658_p8, %p652_p2 }
  0x31   : > { %662 = shalt.err (!%p659_p12)
}
  0x32   : > { %564 = dma.hbm_to_vmem [thread:$0]  (!%p941_p11), %s1192_s2, 128, %s209_s30, [#allocation6]  }
  0x33   : > { %p1193_p1 = scmp.ne.s32.totalorder %s1191_s9, 0  ;;  %p56_p2 = scmp.ne.s32.totalorder %s833_s20, %s829_s19 }
  0x34   : > { %p57_p4 = scmp.eq.s32.totalorder %s845_s23, 0  ;;  %p580_p6 = scmp.lt.s32.totalorder %s845_s23, 2 }
  0x35   : > { %s1213_s7 = smov (%p1193_p1, %s40_s7), 0  ;;  %p1195_p12 = scmp.eq.s32.totalorder %s913_s24, 1 }
  0x36   : > { %1194 = sst [smem:[#allocation17_spill]] %s1213_s7  ;;  %s46_s6 = ssub.s32 %s841_s22, %s1213_s7 }
  0x37   : > { %p47_p8 = scmp.eq.s32.totalorder %s46_s6, 0  ;;  %p58_p9 = por %p57_p4, %p56_p2 }
  0x38   : > { %p979_p13 = por %p1195_p12, %p56_p2  ;;  %s222_s11 = sand.u32 1, %s833_s20  }
  0x39   : > { %s987_s12 = scalar_select %p47_p8, %s833_s20, %s49_s8  }
  0x3a   : > { %s1196_s10 = scalar_select %p979_p13, 1, 0 }
  0x3b   : > { %1197 = sst [smem:[#allocation18_spill]] %s987_s12  ;;  %s989_s30 = sshll.u32 %s222_s11, 3 }
  0x3c   : > { %s534_s9 = sshll.u32 %s841_s22, 7  ;;  %s226_s16 = scalar_lea.vmem [#allocation2], %s989_s30 }
  0x3d   : > { %s995_s15 = scalar_lea.hbm %s1173_s0, %s534_s9  ;;  %s234_s17 = sshll.u32 %s226_s16, 4  ;;  %s998_s17 = int_to_ptr.vmem [resolvable:$true] %s234_s17 }
  0x3e   : > { %p1000_p11 = pnand %p580_p6, %p58_p9  ;;  %s1007_s6 = scalar_lea.hbm %s1174_s1, %s534_s9 }
  0x3f   : > { %s241_s13 = sand.u32 1, %s845_s23   ;;  %s223_s14 = scalar_lea.sflag [#allocation3], %s222_s11 }
  0x40   : > { %s663_s2 = scalar_lea.hbm %s995_s15, 128  ;;  %p665_p3 = pneg %p1000_p11 }
  0x41   : > { %p664_p0 = scmp.ne.s32.totalorder %s995_s15, %s663_s2  ;;  %s668_s22 = scalar_lea.hbm %s1173_s0, 256 }
  0x42   : > { %p669_p10 = scmp.lt.u32.totalorder %s995_s15, %s1173_s0  ;;  %p670_p1 = scmp.lt.u32.totalorder %s668_s22, %s663_s2 }
  0x43   : > { %p666_p5 = pnand %p665_p3, %p664_p0  ;;  %p672_p4 = scmp.lt.u32.totalorder %s663_s2, %s995_s15 }
  0x44   : > { %p671_p2 = por %p670_p1, %p669_p10 }
  0x45   : > { %p667_p7 = pneg %p666_p5 }
  0x46   : > { %p673_p6 = por %p672_p4, %p671_p2 }
  0x48   : > { %p674_p8 = pnand %p673_p6, %p667_p7 }
  0x4a   : > { %677 = shalt.err (!%p674_p8)
}
  0x4b   : > { %s678_s11 = scalar_lea.vmem %s998_s17, 128  ;;  %s848_s7 = smov [#allocation2]  }
  0x4c   : > { %p679_p9 = scmp.ne.s32.totalorder %s998_s17, %s678_s11  ;;  %s683_s9 = sshll.u32 %s848_s7, 4  ;;  %s684_s9 = int_to_ptr.vmem [resolvable:$false] %s683_s9 }
  0x4d   : > { %s685_s12 = scalar_lea.vmem %s684_s9, 256  ;;  %p686_p5 = scmp.lt.s32.totalorder %s998_s17, %s684_s9 }
  0x4e   : > { %p681_p12 = pnand %p679_p9, %p665_p3  ;;  %p687_p10 = scmp.lt.s32.totalorder %s685_s12, %s678_s11 }
  0x50   : > { %p682_p0 = pneg %p681_p12  ;;  %p688_p1 = por %p687_p10, %p686_p5 }
  0x52   : > { %p689_p2 = pnand %p688_p1, %p682_p0 }
  0x54   : > { %692 = shalt.err (!%p689_p2)
}
  0x55   : > { %568 = dma.hbm_to_vmem [thread:$0]  (!%p1000_p11), %s995_s15, 128, %s998_s17, %s223_s14  }
  0x56   : > { %s245_s2 = scalar_lea.vmem [#allocation5], %s989_s30  ;;  %s242_s29 = scalar_lea.sflag [#allocation6], %s241_s13 }
  0x57   : > { %s253_s22 = sshll.u32 %s245_s2, 4  ;;  %s693_s16 = scalar_lea.hbm %s1007_s6, 128  ;;  %s254_s22 = int_to_ptr.vmem [resolvable:$true] %s253_s22 }
  0x58   : > { %p694_p7 = scmp.ne.s32.totalorder %s1007_s6, %s693_s16  ;;  %s698_s7 = scalar_lea.hbm %s1174_s1, 256 }
  0x59   : > { %p699_p8 = scmp.lt.u32.totalorder %s1007_s6, %s1174_s1  ;;  %p700_p9 = scmp.lt.u32.totalorder %s698_s7, %s693_s16 }
  0x5a   : > { %p696_p4 = pnand %p694_p7, %p665_p3  ;;  %p702_p0 = scmp.lt.u32.totalorder %s693_s16, %s1007_s6 }
  0x5b   : > { %p701_p12 = por %p700_p9, %p699_p8 }
  0x5c   : > { %p697_p6 = pneg %p696_p4 }
  0x5d   : > { %p703_p5 = por %p702_p0, %p701_p12 }
  0x5f   : > { %p704_p10 = pnand %p703_p5, %p697_p6 }
  0x61   : > { %707 = shalt.err (!%p704_p10)
}
  0x62   : > { %s708_s30 = scalar_lea.vmem %s254_s22, 128  ;;  %s849_s15 = smov [#allocation5]  }
  0x63   : > { %p709_p1 = scmp.ne.s32.totalorder %s254_s22, %s708_s30  ;;  %s713_s17 = sshll.u32 %s849_s15, 4  ;;  %s714_s17 = int_to_ptr.vmem [resolvable:$false] %s713_s17 }
  0x64   : > { %s715_s13 = scalar_lea.vmem %s714_s17, 256  ;;  %p716_p4 = scmp.lt.s32.totalorder %s254_s22, %s714_s17 }
  0x65   : > { %p711_p2 = pnand %p709_p1, %p665_p3  ;;  %p717_p13 = scmp.lt.s32.totalorder %s715_s13, %s708_s30 }
  0x67   : > { %p712_p7 = pneg %p711_p2  ;;  %p718_p8 = por %p717_p13, %p716_p4 }
  0x69   : > { %p719_p9 = pnand %p718_p8, %p712_p7 }
  0x6b   : > { %722 = shalt.err (!%p719_p9)
}
  0x6c   : > { %571 = dma.hbm_to_vmem [thread:$0]  (!%p1000_p11), %s1007_s6, 128, %s254_s22, %s242_s29  }
  0x6d   : > { %p1199_p6 = scmp.ne.s32.totalorder %s1189_s28, 0 }
  0x6e   : > { %s1060_s14 = sand.u32 (!%p1199_p6), 1, %s829_s19   ;;  %p1200_p13 = scmp.ne.s32.totalorder (!%p1199_p6), %s1187_s26, 0 }
  0x6f   : > { %262 = sbr.rel (%p1199_p6) target bundleno = 177 (0xb1), region = 36  ;;  %s1063_s2 = sshll.u32 (!%p1199_p6), %s1060_s14, 3 }
  0x70   : > { %s265_s16 = scalar_lea.sflag (!%p1199_p6), [#allocation3], %s1060_s14  ;;  %s268_s25 = scalar_lea.vmem (!%p1199_p6), [#allocation2], %s1063_s2 }
  0x76   : > { %804 = dma.done.wait (%p1200_p13), %s265_s16, 128  }
  0x77   : > { %806 = vsyncadd (%p1200_p13), %s265_s16, 4294967168  ;;  %s273_s28 = sand.u32 1, %s913_s24   ;;  %s277_s6 = scalar_lea.vmem [#allocation5], %s1063_s2 }
  0x78   : > { %s274_s8 = scalar_lea.sflag [#allocation6], %s273_s28 }
  0x79   : > { %808 = dma.done.wait (%p1200_p13), %s274_s8, 128  }
  0x7a   : > { %810 = vsyncadd (%p1200_p13), %s274_s8, 4294967168  ;;  %p1201_p11 = scmp.eq.s32.totalorder %s913_s24, 0 }
  0x7c   : > { %812 = dma.done.wait (%p1201_p11), [#allocation6], 128   ;;  %p1202_p3 = pmov %p1201_p11 }
  0x7d   : > { %v325_v0 = vld [vmem:[%s268_s25] sm:$0xff]  ;;  %v326_v1 = vld [vmem:[%s277_s6] sm:$0xff]  ;;  %s545_s26 = sshll.u32 %s837_s21, 7  ;;  %s310_s11 = scalar_lea.vmem [#allocation8], %s1063_s2 }
  0x7e   : > { %814 = vsyncadd (%p1202_p3), [#allocation6], 4294967168  ;;  %v327_v2 = vsub.f32 %v325_v0, %v326_v1  ;;  %v337_v3 = vld [vmem:[%s1176_s3] sm:$0xff]  ;;  %s371_s7 = sshll.u32 %s310_s11, 4  ;;  %s1091_s12 = scalar_lea.hbm %s1177_s4, %s545_s26  ;;  %s1093_s7 = int_to_ptr.vmem [resolvable:$true] %s371_s7 }
  0x7f   : > { %v338_v4 = vmul.f32 %v337_v3, %v337_v3  ;;  %s353_s30 = scalar_lea.sflag [#allocation4], %s1060_s14  ;;  %s723_s15 = scalar_lea.vmem %s1093_s7, 128 }
  0x80   : > { %v328_v5 = vmul.f32 %v327_v2, %v327_v2  ;;  %p724_p12 = scmp.ne.s32.totalorder %s1093_s7, %s723_s15  ;;  %p1203_p0 = scmp.ne.s32.totalorder %s1196_s10, 0 }
  0x81   : > { %633 = vlog2.f32 %v338_v4  ;;  %s850_s17 = smov [#allocation8]  }
  0x82   : > { %332 = vst [vmem:[%s310_s11] sm:$0xff] %v328_v5  ;;  %p725_p5 = pnand %p724_p12, %p1203_p0  ;;  %s727_s13 = sshll.u32 %s850_s17, 4  ;;  %s728_s13 = int_to_ptr.vmem [resolvable:$false] %s727_s13 }
  0x83   : > { %s729_s16 = scalar_lea.vmem %s728_s13, 256  ;;  %p730_p1 = scmp.lt.s32.totalorder %s1093_s7, %s728_s13 }
  0x84   : > { %p726_p10 = pneg %p725_p5  ;;  %p731_p2 = scmp.lt.s32.totalorder %s729_s16, %s723_s15 }
  0x86   : > { %p732_p7 = por %p731_p2, %p730_p1 }
  0x88   : > { %p733_p4 = pnand %p732_p7, %p726_p10 }
  0x8a   : > { %736 = shalt.err (!%p733_p4)
}
  0x8b   : > { %s737_s25 = scalar_lea.hbm %s1091_s12, 128  ;;  %s741_s6 = scalar_lea.hbm %s1177_s4, 256 }
  0x8c   : > { %p738_p8 = scmp.ne.s32.totalorder %s1091_s12, %s737_s25  ;;  %p742_p13 = scmp.lt.u32.totalorder %s1091_s12, %s1177_s4 }
  0x8d   : > { %p743_p11 = scmp.lt.u32.totalorder %s741_s6, %s737_s25  ;;  %p745_p12 = scmp.lt.u32.totalorder %s737_s25, %s1091_s12 }
  0x8e   : > { %p739_p9 = pnand %p738_p8, %p1203_p0 }
  0x8f   : > { %p744_p3 = por %p743_p11, %p742_p13 }
  0x90   : > { %p740_p6 = pneg %p739_p9 }
  0x91   : > { %p746_p5 = por %p745_p12, %p744_p3 }
  0x93   : > { %p747_p10 = pnand %p746_p5, %p740_p6 }
  0x95   : > { %750 = shalt.err (!%p747_p10)
}
  0x96   : > { %557 = dma.vmem_to_hbm [thread:$0]  (%p1203_p0), %s1093_s7, 128, %s1091_s12, %s353_s30   ;;  %v336_v6 = vld [vmem:[#allocation7] sm:$0xff]  ;;  %v634_v7 = vpop.eup %633 }
  0x97   : > { %p346_p1 = scmp.eq.s32.totalorder %s837_s21, 0  ;;  %v340_v8 = vmul.f32 0.6931472, %v634_v7  ;;  %v342_v9 = vmul.f32 %v336_v6, %v336_v6  ;;  %s317_s24 = scalar_lea.vmem [#allocation9], %s1063_s2 }
  0x98   : > { %s384_s9 = sshll.u32 %s317_s24, 4  ;;  %s1126_s12 = scalar_lea.hbm %s1178_s5, %s545_s26  ;;  %s1119_s9 = int_to_ptr.vmem [resolvable:$true] %s384_s9 }
  0x99   : > { %s347_s11 = scalar_select %p346_p1, 1, 0  ;;  %v341_v10 = vadd.f32 1.0, %v340_v8 }
  0x9a   : > { %s358_s30 = scalar_lea.sflag [#allocation10], %s1060_s14  ;;  %s751_s17 = scalar_lea.vmem %s1119_s9, 128 }
  0x9b   : > { %v348_v11 = vstv %s347_s11  ;;  %v343_v12 = vsub.f32 %v341_v10, %v342_v9  ;;  %p752_p2 = scmp.ne.s32.totalorder %s1119_s9, %s751_s17  ;;  %s851_s2 = smov [#allocation9]  }
  0x9c   : > { %vm349_vm0 = vcmp.eq.s32.totalorder %v348_v11, 1  ;;  %s755_s13 = sshll.u32 %s851_s2, 4  ;;  %s756_s13 = int_to_ptr.vmem [resolvable:$false] %s755_s13 }
  0x9d   : > { %v344_v13 = vsub.f32 %v343_v12, %v338_v4  ;;  %p753_p7 = pnand %p752_p2, %p1203_p0  ;;  %s757_s21 = scalar_lea.vmem %s756_s13, 256 }
  0x9e   : > { %p758_p8 = scmp.lt.s32.totalorder %s1119_s9, %s756_s13  ;;  %p759_p9 = scmp.lt.s32.totalorder %s757_s21, %s751_s17 }
  0x9f   : > { %v350_v14 = vsel %vm349_vm0, %v344_v13, 0.0  ;;  %p754_p4 = pneg %p753_p7 }
  0xa0   : > { %351 = vst [vmem:[%s317_s24] sm:$0xff] %v350_v14  ;;  %p760_p6 = por %p759_p9, %p758_p8 }
  0xa2   : > { %p761_p13 = pnand %p760_p6, %p754_p4 }
  0xa4   : > { %764 = shalt.err (!%p761_p13)
}
  0xa5   : > { %s765_s14 = scalar_lea.hbm %s1126_s12, 128  ;;  %s769_s25 = scalar_lea.hbm %s1178_s5, 256 }
  0xa6   : > { %p766_p11 = scmp.ne.s32.totalorder %s1126_s12, %s765_s14  ;;  %p770_p5 = scmp.lt.u32.totalorder %s1126_s12, %s1178_s5 }
  0xa7   : > { %p771_p10 = scmp.lt.u32.totalorder %s769_s25, %s765_s14  ;;  %p773_p2 = scmp.lt.u32.totalorder %s765_s14, %s1126_s12 }
  0xa8   : > { %p767_p3 = pnand %p766_p11, %p1203_p0 }
  0xa9   : > { %p772_p1 = por %p771_p10, %p770_p5 }
  0xaa   : > { %p768_p12 = pneg %p767_p3 }
  0xab   : > { %p774_p7 = por %p773_p2, %p772_p1 }
  0xad   : > { %p775_p4 = pnand %p774_p7, %p768_p12 }
  0xaf   : > { %778 = shalt.err (!%p775_p4)
}
  0xb0   : > { %558 = dma.vmem_to_hbm [thread:$0]  (%p1203_p0), %s1119_s9, 128, %s1126_s12, %s358_s30  }
  0xb1 PF: > { %s396_s6 = sand.u32 1, %s825_s18   ;;  %p1204_p8 = scmp.ne.s32.totalorder %s1188_s27, 0 }
  0xb2   : > { %p1205_p9 = scmp.ge.s32.totalorder %s845_s23, 2  ;;  %s397_s22 = scalar_lea.sflag [#allocation4], %s396_s6 }
  0xb4   : > { %p573_p6 = pnand %p1205_p9, %p1204_p8 }
  0xb6   : > { %816 = dma.done.wait (!%p573_p6), %s397_s22, 128  }
  0xb7   : > { %818 = vsyncadd (!%p573_p6), %s397_s22, 4294967168  ;;  %s406_s29 = scalar_lea.sflag [#allocation10], %s396_s6 }
  0xb8   : > { %820 = dma.done.wait (!%p573_p6), %s406_s29, 128  }
  0xb9   : > { %822 = vsyncadd (!%p573_p6), %s406_s29, 4294967168  ;;  %s28_s23 = sadd.s32 1, %s845_s23   ;;  %s1206_s10 = sld [smem:[#allocation18_spill]] }
  0xba   : > { %p25_p13 = scmp.ge.s32.totalorder %s28_s23, 4   ;;  %s1207_s21 = sld [smem:[#allocation16_spill]] }
  0xbb   : > { %s1208_s22 = sld [smem:[#allocation17_spill]]  ;;  %s1209_s18 = smov %s829_s19 }
  0xbc   : > { %s1210_s19 = smov %s833_s20  ;;  %27 = sbr.rel (!%p25_p13) target bundleno = 12 (0xc), region = 123 }
  0xbf   : > { %s1211_s20 = smov %s1206_s10 }
  0xc3   :  { %411 = vsyncpa [#allocation3], 1 }
  0xc4   :  { %413 = vsyncpa [#allocation3 + $0x1], 1 }
  0xc5   :  { %414 = vsyncpa [#allocation6], 1 }
  0xc6   :  { %416 = vsyncpa [#allocation6 + $0x1], 1 }
  0xc7   :  { %417 = vsyncpa [#allocation4], 1 }
  0xc8   :  { %419 = vsyncpa [#allocation4 + $0x1], 1 }
  0xc9   :  { %420 = vsyncpa [#allocation10], 1 }
  0xca   :  { %422 = vsyncpa [#allocation10 + $0x1], 1 }

</bundles_post_ra>
